<compile_context>
chip_gen: v7x
topology: tpu7x:2x2x1
jax: 0.10.0
libtpu: 0.0.40
codegen_flags: <defaults>
</compile_context>

<pallas_src>
import jax
import jax.numpy as jnp
from jax.experimental import pallas as pl
from jax.experimental.pallas import tpu as pltpu

LEN_OF_FP = 60
IN_DIM = 2 * LEN_OF_FP            # 120  (torch input width; 8-divisible)
H1, H2, H3 = 512, 256, 256
H4_RAW, OUT_RAW = 32, 2           # torch fc4 / fc5 widths
H4_PAD, OUT_PAD = 128, 128        # lane-aligned (zero-padded) widths
BN_EPS = 1e-5
MAX_BATCH_BLOCK = 1024            # rows per grid step (upper bound)
MIN_BATCH_BLOCK = 256             # keep per-step overhead (~0.35us) negligible


def _round_up(n, m):
    return ((n + m - 1) // m) * m


def _epilogue_dtype():
    """bf16 shift+ReLU on chips with a bf16 VPU (v6e / v7x); f32 otherwise.
    The f32 path is always correct -- this gate is perf-only."""
    try:
        kind = jax.devices()[0].device_kind.lower()
    except Exception:
        return jnp.float32
    if any(tag in kind for tag in ("v2", "v3", "v4", "v5")):
        return jnp.float32
    return jnp.bfloat16


def _pick_batch_block(batch,
                      max_block=MAX_BATCH_BLOCK,
                      min_block=MIN_BATCH_BLOCK):
    """Aim for ~4 grid steps (feeds both v7x TensorCores, keeps the BlockSpec
    pipeline primed) while keeping every step between min_block and max_block
    rows. Small batches get a single block of the (8-rounded) batch size."""
    b8 = _round_up(batch, 8)
    block = _round_up(max(min_block, pl.cdiv(b8, 4)), 8)
    return min(block, max_block, b8)


def _mlp_kernel(x_ref,
                w1_ref, t1_ref,
                w2_ref, t2_ref,
                w3_ref, t3_ref,
                w4_ref, t4_ref,
                w5_ref, t5_ref,
                out_ref):
    """Fused 5-layer MLP. Bias + eval-mode BatchNorm1d are pre-folded into
    (bf16 weight, shift). Dropout is identity at inference."""
    # TODO(synk): dropout omitted (inference mode => identity)

    def layer(h_bf16, w_ref, t_ref):
        # MXU matmul: bf16 operands, f32 accumulation.
        z = jnp.dot(h_bf16, w_ref[...], preferred_element_type=jnp.float32)
        t = t_ref[...]
        if t.dtype == jnp.bfloat16:
            # bf16 VPU path (v6e / v7x): one f32->bf16 cast, add+relu in bf16.
            return jnp.maximum(z.astype(jnp.bfloat16) + t, 0)
        # f32 VPU path (v5e and older have no bf16 VALU).
        return jnp.maximum(z + t, 0.0).astype(jnp.bfloat16)

    h = x_ref[...].astype(jnp.bfloat16)      # load-and-narrow on the VPU
    h = layer(h, w1_ref, t1_ref)
    h = layer(h, w2_ref, t2_ref)
    h = layer(h, w3_ref, t3_ref)
    h = layer(h, w4_ref, t4_ref)

    # Final linear (no BN, no activation). Matmul stays 128-wide (padded
    # columns are exactly zero); only the first 2 columns are stored.
    z = jnp.dot(h, w5_ref[...], preferred_element_type=jnp.float32) + t5_ref[...]
    out_ref[...] = z[:, :OUT_RAW].astype(out_ref.dtype)


def neural_net_forward(x, folded, *, batch_block=None):
    """x: (B, 120) float32. folded: dict of folded/padded kernel params.

    Returns (B, 2) float32 logits."""
    B = x.shape[0]
    if batch_block is None:
        batch_block = _pick_batch_block(B)
    n_blocks = pl.cdiv(B, batch_block)
    Bp = n_blocks * batch_block
    if Bp != B:                               # row-pad only when needed
        x = jnp.pad(x, ((0, Bp - B), (0, 0)))

    def resident_spec(shape):
        # Same block index every grid step -> stays resident in VMEM.
        return pl.BlockSpec(shape, lambda i: (0, 0))

    args = [x]
    in_specs = [pl.BlockSpec((batch_block, IN_DIM), lambda i: (i, 0))]
    weight_bytes = 0
    for li in range(1, 6):
        w = folded[f"w{li}"]
        t = folded[f"t{li}"]
        args += [w, t]
        in_specs += [resident_spec(w.shape), resident_spec(t.shape)]
        weight_bytes += w.size * w.dtype.itemsize + t.size * t.dtype.itemsize

    # MXU work actually performed (padded tail layers included).
    flops = 2 * Bp * (IN_DIM * H1 + H1 * H2 + H2 * H3 + H3 * H4_PAD
                      + H4_PAD * OUT_PAD)
    cost = pl.CostEstimate(
        flops=flops,
        transcendentals=0,
        bytes_accessed=Bp * (IN_DIM * 4 + OUT_RAW * 4) + weight_bytes)

    out = pl.pallas_call(
        _mlp_kernel,
        out_shape=jax.ShapeDtypeStruct((Bp, OUT_RAW), jnp.float32),
        grid=(n_blocks,),
        in_specs=in_specs,
        out_specs=pl.BlockSpec((batch_block, OUT_RAW), lambda i: (i, 0)),
        compiler_params=pltpu.CompilerParams(
            dimension_semantics=("parallel",)),
        cost_estimate=cost,
    )(*args)

    return out[:B]


def init_raw_params(key):
    """Torch-like parameters: Linear weights stored (in, out), biases (out,),
    BatchNorm gamma/beta/running_mean/running_var per hidden layer."""
    dims = [IN_DIM, H1, H2, H3, H4_RAW, OUT_RAW]
    params = {}
    keys = iter(jax.random.split(key, 40))
    for i in range(1, 6):
        fan_in, fan_out = dims[i - 1], dims[i]
        bound = 1.0 / jnp.sqrt(jnp.float32(fan_in))
        params[f"w{i}"] = jax.random.uniform(
            next(keys), (fan_in, fan_out), jnp.float32, -bound, bound)
        params[f"b{i}"] = jax.random.uniform(
            next(keys), (fan_out,), jnp.float32, -bound, bound)
        if i < 5:
            params[f"gamma{i}"] = 1.0 + 0.1 * jax.random.normal(
                next(keys), (fan_out,), jnp.float32)
            params[f"beta{i}"] = 0.1 * jax.random.normal(
                next(keys), (fan_out,), jnp.float32)
            params[f"mean{i}"] = 0.05 * jax.random.normal(
                next(keys), (fan_out,), jnp.float32)
            params[f"var{i}"] = jnp.abs(1.0 + 0.1 * jax.random.normal(
                next(keys), (fan_out,), jnp.float32))
    return params


def fold_params(raw, shift_dtype=None):
    """Fold bias + eval-mode BatchNorm into (bf16 weight, shift) and zero-pad
    the narrow tail layers to lane-aligned shapes. Hidden-layer shifts are
    stored in `shift_dtype` (bf16 on v6e/v7x, f32 on v5e)."""
    if shift_dtype is None:
        shift_dtype = _epilogue_dtype()
    folded = {}
    for i in range(1, 6):
        w = raw[f"w{i}"]
        b = raw[f"b{i}"]
        if i < 5:
            scale = raw[f"gamma{i}"] / jnp.sqrt(raw[f"var{i}"] + BN_EPS)
            w = w * scale[None, :]
            t = (b - raw[f"mean{i}"]) * scale + raw[f"beta{i}"]
        else:
            t = b
        if i == 4:                         # 32 -> 128 output columns
            w = jnp.pad(w, ((0, 0), (0, H4_PAD - H4_RAW)))
            t = jnp.pad(t, (0, H4_PAD - H4_RAW))
        if i == 5:                         # 32 -> 128 rows, 2 -> 128 columns
            w = jnp.pad(w, ((0, H4_PAD - H4_RAW), (0, OUT_PAD - OUT_RAW)))
            t = jnp.pad(t, (0, OUT_PAD - OUT_RAW))
        folded[f"w{i}"] = w.astype(jnp.bfloat16)
        t_dtype = jnp.float32 if i == 5 else shift_dtype
        folded[f"t{i}"] = t[None, :].astype(t_dtype)
    return folded


def _reference_forward(x, folded):
    """Pure-JAX reference replicating the kernel's mixed-precision path."""
    h = x.astype(jnp.bfloat16)
    for i in range(1, 5):
        z = jnp.dot(h.astype(jnp.float32), folded[f"w{i}"].astype(jnp.float32))
        t = folded[f"t{i}"]
        if t.dtype == jnp.bfloat16:
            h = jnp.maximum(z.astype(jnp.bfloat16) + t, 0)
        else:
            h = jnp.maximum(z + t, 0.0).astype(jnp.bfloat16)
    z = jnp.dot(h.astype(jnp.float32),
                folded["w5"].astype(jnp.float32)) + folded["t5"]
    return z[:, :OUT_RAW]


if __name__ == "__main__":
    key = jax.random.PRNGKey(0)
    pkey, xkey = jax.random.split(key)
    raw = init_raw_params(pkey)
    folded = fold_params(raw)

    B = 8
    x = jax.random.normal(xkey, (B, IN_DIM), jnp.float32)

    out = neural_net_forward(x, folded)
    out = jax.block_until_ready(out)

    assert out.shape == (B, OUT_RAW), out.shape
    assert out.dtype == jnp.float32
    assert bool(jnp.all(jnp.isfinite(out)))

    ref = _reference_forward(x, folded)
    max_err = float(jnp.max(jnp.abs(out - ref)))
    assert max_err < 5e-2, f"mismatch vs reference: {max_err}"

    print("KERNEL_OK")
</pallas_src>

<mosaic_0001>
module attributes {stable_mosaic.version = 11 : i64} {
  func.func @_mlp_kernel(%arg0: i32, %arg1: memref<8x120xf32, #tpu.memory_space<vmem>>, %arg2: memref<120x512xbf16, #tpu.memory_space<vmem>>, %arg3: memref<1x512xbf16, #tpu.memory_space<vmem>>, %arg4: memref<512x256xbf16, #tpu.memory_space<vmem>>, %arg5: memref<1x256xbf16, #tpu.memory_space<vmem>>, %arg6: memref<256x256xbf16, #tpu.memory_space<vmem>>, %arg7: memref<1x256xbf16, #tpu.memory_space<vmem>>, %arg8: memref<256x128xbf16, #tpu.memory_space<vmem>>, %arg9: memref<1x128xbf16, #tpu.memory_space<vmem>>, %arg10: memref<128x128xbf16, #tpu.memory_space<vmem>>, %arg11: memref<1x128xf32, #tpu.memory_space<vmem>>, %arg12: memref<8x2xf32, #tpu.memory_space<vmem>>) attributes {dimension_semantics = [#tpu.dimension_semantics<parallel>], iteration_bounds = array<i64: 1>, scalar_prefetch = 0 : i64, scratch_operands = 0 : i64, tpu.core_type = #tpu.core_type<tc>, window_params = [{transform_indices = @transform_0, window_bounds = array<i64: 8, 120>}, {pipeline_mode = #tpu.pipeline_mode<synchronous>, transform_indices = @transform_1, window_bounds = array<i64: 120, 512>}, {pipeline_mode = #tpu.pipeline_mode<synchronous>, transform_indices = @transform_2, window_bounds = array<i64: 1, 512>}, {pipeline_mode = #tpu.pipeline_mode<synchronous>, transform_indices = @transform_3, window_bounds = array<i64: 512, 256>}, {pipeline_mode = #tpu.pipeline_mode<synchronous>, transform_indices = @transform_4, window_bounds = array<i64: 1, 256>}, {pipeline_mode = #tpu.pipeline_mode<synchronous>, transform_indices = @transform_5, window_bounds = array<i64: 256, 256>}, {pipeline_mode = #tpu.pipeline_mode<synchronous>, transform_indices = @transform_6, window_bounds = array<i64: 1, 256>}, {pipeline_mode = #tpu.pipeline_mode<synchronous>, transform_indices = @transform_7, window_bounds = array<i64: 256, 128>}, {pipeline_mode = #tpu.pipeline_mode<synchronous>, transform_indices = @transform_8, window_bounds = array<i64: 1, 128>}, {pipeline_mode = #tpu.pipeline_mode<synchronous>, transform_indices = @transform_9, window_bounds = array<i64: 128, 128>}, {pipeline_mode = #tpu.pipeline_mode<synchronous>, transform_indices = @transform_10, window_bounds = array<i64: 1, 128>}, {transform_indices = @transform_11, window_bounds = array<i64: 8, 2>}]} {
    %c0 = arith.constant 0 : index
    %c0_0 = arith.constant 0 : index
    %0 = vector.load %arg1[%c0, %c0_0] : memref<8x120xf32, #tpu.memory_space<vmem>>, vector<8x120xf32>
    %1 = arith.truncf %0 : vector<8x120xf32> to vector<8x120xbf16>
    %c0_1 = arith.constant 0 : index
    %c0_2 = arith.constant 0 : index
    %2 = vector.load %arg2[%c0_1, %c0_2] : memref<120x512xbf16, #tpu.memory_space<vmem>>, vector<120x512xbf16>
    %cst = arith.constant dense<0.000000e+00> : vector<8x512xf32>
    %3 = tpu.matmul %1, %2, %cst {dimension_numbers = #tpu.dot_dimension_numbers<[1], [0], [0], [1], [0, 0, 1, 1], [], []>} : vector<8x120xbf16>, vector<120x512xbf16>, vector<8x512xf32> -> vector<8x512xf32>
    %c0_3 = arith.constant 0 : index
    %c0_4 = arith.constant 0 : index
    %4 = vector.load %arg3[%c0_3, %c0_4] : memref<1x512xbf16, #tpu.memory_space<vmem>>, vector<1x512xbf16>
    %5 = arith.truncf %3 : vector<8x512xf32> to vector<8x512xbf16>
    %6 = vector.broadcast %4 : vector<1x512xbf16> to vector<8x512xbf16>
    %7 = arith.addf %5, %6 : vector<8x512xbf16>
    %cst_5 = arith.constant 0.000000e+00 : bf16
    %8 = vector.broadcast %cst_5 : bf16 to vector<8x512xbf16>
    %9 = arith.maximumf %7, %8 : vector<8x512xbf16>
    %c0_6 = arith.constant 0 : index
    %c0_7 = arith.constant 0 : index
    %10 = vector.load %arg4[%c0_6, %c0_7] : memref<512x256xbf16, #tpu.memory_space<vmem>>, vector<512x256xbf16>
    %cst_8 = arith.constant dense<0.000000e+00> : vector<8x256xf32>
    %11 = tpu.matmul %9, %10, %cst_8 {dimension_numbers = #tpu.dot_dimension_numbers<[1], [0], [0], [1], [0, 0, 1, 1], [], []>} : vector<8x512xbf16>, vector<512x256xbf16>, vector<8x256xf32> -> vector<8x256xf32>
    %c0_9 = arith.constant 0 : index
    %c0_10 = arith.constant 0 : index
    %12 = vector.load %arg5[%c0_9, %c0_10] : memref<1x256xbf16, #tpu.memory_space<vmem>>, vector<1x256xbf16>
    %13 = arith.truncf %11 : vector<8x256xf32> to vector<8x256xbf16>
    %14 = vector.broadcast %12 : vector<1x256xbf16> to vector<8x256xbf16>
    %15 = arith.addf %13, %14 : vector<8x256xbf16>
    %cst_11 = arith.constant 0.000000e+00 : bf16
    %16 = vector.broadcast %cst_11 : bf16 to vector<8x256xbf16>
    %17 = arith.maximumf %15, %16 : vector<8x256xbf16>
    %c0_12 = arith.constant 0 : index
    %c0_13 = arith.constant 0 : index
    %18 = vector.load %arg6[%c0_12, %c0_13] : memref<256x256xbf16, #tpu.memory_space<vmem>>, vector<256x256xbf16>
    %cst_14 = arith.constant dense<0.000000e+00> : vector<8x256xf32>
    %19 = tpu.matmul %17, %18, %cst_14 {dimension_numbers = #tpu.dot_dimension_numbers<[1], [0], [0], [1], [0, 0, 1, 1], [], []>} : vector<8x256xbf16>, vector<256x256xbf16>, vector<8x256xf32> -> vector<8x256xf32>
    %c0_15 = arith.constant 0 : index
    %c0_16 = arith.constant 0 : index
    %20 = vector.load %arg7[%c0_15, %c0_16] : memref<1x256xbf16, #tpu.memory_space<vmem>>, vector<1x256xbf16>
    %21 = arith.truncf %19 : vector<8x256xf32> to vector<8x256xbf16>
    %22 = vector.broadcast %20 : vector<1x256xbf16> to vector<8x256xbf16>
    %23 = arith.addf %21, %22 : vector<8x256xbf16>
    %cst_17 = arith.constant 0.000000e+00 : bf16
    %24 = vector.broadcast %cst_17 : bf16 to vector<8x256xbf16>
    %25 = arith.maximumf %23, %24 : vector<8x256xbf16>
    %c0_18 = arith.constant 0 : index
    %c0_19 = arith.constant 0 : index
    %26 = vector.load %arg8[%c0_18, %c0_19] : memref<256x128xbf16, #tpu.memory_space<vmem>>, vector<256x128xbf16>
    %cst_20 = arith.constant dense<0.000000e+00> : vector<8x128xf32>
    %27 = tpu.matmul %25, %26, %cst_20 {dimension_numbers = #tpu.dot_dimension_numbers<[1], [0], [0], [1], [0, 0, 1, 1], [], []>} : vector<8x256xbf16>, vector<256x128xbf16>, vector<8x128xf32> -> vector<8x128xf32>
    %c0_21 = arith.constant 0 : index
    %c0_22 = arith.constant 0 : index
    %28 = vector.load %arg9[%c0_21, %c0_22] : memref<1x128xbf16, #tpu.memory_space<vmem>>, vector<1x128xbf16>
    %29 = arith.truncf %27 : vector<8x128xf32> to vector<8x128xbf16>
    %30 = vector.broadcast %28 : vector<1x128xbf16> to vector<8x128xbf16>
    %31 = arith.addf %29, %30 : vector<8x128xbf16>
    %cst_23 = arith.constant 0.000000e+00 : bf16
    %32 = vector.broadcast %cst_23 : bf16 to vector<8x128xbf16>
    %33 = arith.maximumf %31, %32 : vector<8x128xbf16>
    %c0_24 = arith.constant 0 : index
    %c0_25 = arith.constant 0 : index
    %34 = vector.load %arg10[%c0_24, %c0_25] : memref<128x128xbf16, #tpu.memory_space<vmem>>, vector<128x128xbf16>
    %cst_26 = arith.constant dense<0.000000e+00> : vector<8x128xf32>
    %35 = tpu.matmul %33, %34, %cst_26 {dimension_numbers = #tpu.dot_dimension_numbers<[1], [0], [0], [1], [0, 0, 1, 1], [], []>} : vector<8x128xbf16>, vector<128x128xbf16>, vector<8x128xf32> -> vector<8x128xf32>
    %c0_27 = arith.constant 0 : index
    %c0_28 = arith.constant 0 : index
    %36 = vector.load %arg11[%c0_27, %c0_28] : memref<1x128xf32, #tpu.memory_space<vmem>>, vector<1x128xf32>
    %37 = vector.broadcast %36 : vector<1x128xf32> to vector<8x128xf32>
    %38 = arith.addf %35, %37 : vector<8x128xf32>
    %39 = vector.extract_strided_slice %38 {offsets = [0, 0], sizes = [8, 2], strides = [1, 1]} : vector<8x128xf32> to vector<8x2xf32>
    %c0_29 = arith.constant 0 : index
    %c0_30 = arith.constant 0 : index
    %40 = vector.load %arg12[%c0_29, %c0_30] : memref<8x2xf32, #tpu.memory_space<vmem>>, vector<8x2xf32>
    tpu.vector_store %arg12[%c0_29, %c0_30], %39 {strides = array<i32>} : memref<8x2xf32, #tpu.memory_space<vmem>>, vector<8x2xf32>,
    return
  }
  func.func @transform_0(%arg0: i32) -> (i32, i32) {
    %c0_i32 = arith.constant 0 : i32
    %c0_i32_0 = arith.constant 0 : i32
    return %arg0, %c0_i32 : i32, i32
  }
  func.func @transform_1(%arg0: i32) -> (i32, i32) {
    %c0_i32 = arith.constant 0 : i32
    %c0_i32_0 = arith.constant 0 : i32
    %c0_i32_1 = arith.constant 0 : i32
    return %c0_i32, %c0_i32_0 : i32, i32
  }
  func.func @transform_2(%arg0: i32) -> (i32, i32) {
    %c0_i32 = arith.constant 0 : i32
    %c0_i32_0 = arith.constant 0 : i32
    %c0_i32_1 = arith.constant 0 : i32
    return %c0_i32, %c0_i32_0 : i32, i32
  }
  func.func @transform_3(%arg0: i32) -> (i32, i32) {
    %c0_i32 = arith.constant 0 : i32
    %c0_i32_0 = arith.constant 0 : i32
    %c0_i32_1 = arith.constant 0 : i32
    return %c0_i32, %c0_i32_0 : i32, i32
  }
  func.func @transform_4(%arg0: i32) -> (i32, i32) {
    %c0_i32 = arith.constant 0 : i32
    %c0_i32_0 = arith.constant 0 : i32
    %c0_i32_1 = arith.constant 0 : i32
    return %c0_i32, %c0_i32_0 : i32, i32
  }
  func.func @transform_5(%arg0: i32) -> (i32, i32) {
    %c0_i32 = arith.constant 0 : i32
    %c0_i32_0 = arith.constant 0 : i32
    %c0_i32_1 = arith.constant 0 : i32
    return %c0_i32, %c0_i32_0 : i32, i32
  }
  func.func @transform_6(%arg0: i32) -> (i32, i32) {
    %c0_i32 = arith.constant 0 : i32
    %c0_i32_0 = arith.constant 0 : i32
    %c0_i32_1 = arith.constant 0 : i32
    return %c0_i32, %c0_i32_0 : i32, i32
  }
  func.func @transform_7(%arg0: i32) -> (i32, i32) {
    %c0_i32 = arith.constant 0 : i32
    %c0_i32_0 = arith.constant 0 : i32
    %c0_i32_1 = arith.constant 0 : i32
    return %c0_i32, %c0_i32_0 : i32, i32
  }
  func.func @transform_8(%arg0: i32) -> (i32, i32) {
    %c0_i32 = arith.constant 0 : i32
    %c0_i32_0 = arith.constant 0 : i32
    %c0_i32_1 = arith.constant 0 : i32
    return %c0_i32, %c0_i32_0 : i32, i32
  }
  func.func @transform_9(%arg0: i32) -> (i32, i32) {
    %c0_i32 = arith.constant 0 : i32
    %c0_i32_0 = arith.constant 0 : i32
    %c0_i32_1 = arith.constant 0 : i32
    return %c0_i32, %c0_i32_0 : i32, i32
  }
  func.func @transform_10(%arg0: i32) -> (i32, i32) {
    %c0_i32 = arith.constant 0 : i32
    %c0_i32_0 = arith.constant 0 : i32
    %c0_i32_1 = arith.constant 0 : i32
    return %c0_i32, %c0_i32_0 : i32, i32
  }
  func.func @transform_11(%arg0: i32) -> (i32, i32) {
    %c0_i32 = arith.constant 0 : i32
    %c0_i32_0 = arith.constant 0 : i32
    return %arg0, %c0_i32 : i32, i32
  }
}

</mosaic_0001>

<bundles_post_ra>
// kernel: tpu_custom_call.1
= control target key start
LH: loop header
LB: loop body
LE: loop exit
PB: predicated region body
PF: predicated region fallthrough
CT: control target
= control target key end

     0   :  { %16 = vsyncpa [#allocation3], 0  ;;  %s2356_s0 = inlined_call_operand.hbm [shape: f32[8,120], index: 0, kind: input, shape index: {}]   ;;  %s2357_s1 = inlined_call_operand.hbm [shape: bf16[120,512], index: 1, kind: input, shape index: {}]   ;;  %s2358_s2 = inlined_call_operand.vmem [shape: bf16[1,512], index: 2, kind: input, shape index: {}]   ;;  %s2359_s3 = inlined_call_operand.hbm [shape: bf16[512,256], index: 3, kind: input, shape index: {}]   ;;  %s2360_s4 = inlined_call_operand.vmem [shape: bf16[1,256], index: 4, kind: input, shape index: {}]   ;;  %s2361_s5 = inlined_call_operand.hbm [shape: bf16[256,256], index: 5, kind: input, shape index: {}]   ;;  %s2362_s6 = inlined_call_operand.vmem [shape: bf16[1,256], index: 6, kind: input, shape index: {}]   ;;  %s2363_s7 = inlined_call_operand.hbm [shape: bf16[256,128], index: 7, kind: input, shape index: {}]   ;;  %s2364_s8 = inlined_call_operand.vmem [shape: bf16[1,128], index: 8, kind: input, shape index: {}]   ;;  %s2365_s9 = inlined_call_operand.hbm [shape: bf16[128,128], index: 9, kind: input, shape index: {}]   ;;  %s2366_s10 = inlined_call_operand.vmem [shape: f32[1,128], index: 10, kind: input, shape index: {}]   ;;  %s2367_s11 = inlined_call_operand.vmem [shape: f32[8,2], index: 11, kind: output, shape index: {}]  }
   0x1   :  { %17 = vsyncpa [#allocation5], 0 }
   0x2   :  { %18 = vsyncpa [#allocation8], 0 }
   0x3   :  { %19 = vsyncpa [#allocation11], 0  ;;  %s2138_s17 = smov [#allocation4]   ;;  %s1998_s21 = scalar_lea.hbm %s2357_s1, 3840 }
   0x4   :  { %s35_s18 = sshll.u32 %s2138_s17, 4  ;;  %p1999_p0 = scmp.ne.s32.totalorder %s2357_s1, %s1998_s21  ;;  %s36_s18 = int_to_ptr.vmem [resolvable:$true] %s35_s18 }
   0x5   :  { %p2002_p1 = scmp.lt.u32.totalorder %s1998_s21, %s2357_s1 }
   0x7   :  { %p2004_p2 = pnand %p2002_p1, %p1999_p0 }
   0x9   :  { %2007 = shalt.err (!%p2004_p2)
}
   0xa   :  { %s2008_s26 = scalar_lea.vmem %s36_s18, 3840  ;;  %p2013_p4 = scmp.lt.s32.totalorder %s36_s18, %s36_s18 }
   0xb   :  { %p2009_p3 = scmp.ne.s32.totalorder %s36_s18, %s2008_s26  ;;  %p2014_p5 = scmp.lt.s32.totalorder %s2008_s26, %s2008_s26 }
   0xd   :  { %p2015_p6 = por %p2014_p5, %p2013_p4 }
   0xf   :  { %p2016_p7 = pnand %p2015_p6, %p2009_p3 }
  0x11   :  { %2019 = shalt.err (!%p2016_p7)
}
  0x12   :  { %s2139_s27 = smov 256   ;;  %s2140_s28 = smov 16  }
  0x13   :  { %41 = dma.hbm_to_vmem [thread:$0]  %s2357_s1, 3840, %s36_s18, [#allocation5], %s2139_s27, %s2139_s27, %s2140_s28  }
  0x14   :  { %s2141_s12 = smov [#allocation7]   ;;  %s2142_s14 = smov [#allocation2]  }
  0x15   :  { %s63_s13 = sshll.u32 %s2141_s12, 4  ;;  %s26_s15 = sshll.u32 %s2142_s14, 4  ;;  %s64_s13 = int_to_ptr.vmem [resolvable:$true] %s63_s13  ;;  %s27_s15 = int_to_ptr.vmem [resolvable:$true] %s26_s15 }
  0x16   :  { %s2020_s19 = scalar_lea.hbm %s2361_s5, 4096 }
  0x17   :  { %p2021_p8 = scmp.ne.s32.totalorder %s2361_s5, %s2020_s19  ;;  %p2024_p9 = scmp.lt.u32.totalorder %s2020_s19, %s2361_s5 }
  0x19   :  { %p2026_p10 = pnand %p2024_p9, %p2021_p8 }
  0x1b   :  { %2029 = shalt.err (!%p2026_p10)
}
  0x1c   :  { %s2030_s1 = scalar_lea.vmem %s64_s13, 4096  ;;  %p2035_p12 = scmp.lt.s32.totalorder %s64_s13, %s64_s13 }
  0x1d   :  { %p2031_p11 = scmp.ne.s32.totalorder %s64_s13, %s2030_s1  ;;  %p2036_p13 = scmp.lt.s32.totalorder %s2030_s1, %s2030_s1 }
  0x1f   :  { %p2037_p0 = por %p2036_p13, %p2035_p12 }
  0x21   :  { %p2038_p1 = pnand %p2037_p0, %p2031_p11 }
  0x23   :  { %2041 = shalt.err (!%p2038_p1)
}
  0x24   :  { %s2143_s18 = smov 128   ;;  %s2144_s24 = smov 8  }
  0x25   :  { %69 = dma.hbm_to_vmem [thread:$0]  %s2361_s5, 4096, %s64_s13, [#allocation8], %s2143_s18, %s2143_s18, %s2144_s24  }
  0x26   :  { %s2042_s29 = scalar_lea.hbm %s2356_s0, 128 }
  0x27   :  { %p2043_p2 = scmp.ne.s32.totalorder %s2356_s0, %s2042_s29  ;;  %p2046_p3 = scmp.lt.u32.totalorder %s2042_s29, %s2356_s0 }
  0x29   :  { %p2048_p4 = pnand %p2046_p3, %p2043_p2 }
  0x2b   :  { %2051 = shalt.err (!%p2048_p4)
}
  0x2c   :  { %s2052_s17 = scalar_lea.vmem %s27_s15, 128  ;;  %p2057_p6 = scmp.lt.s32.totalorder %s27_s15, %s27_s15 }
  0x2d   :  { %p2053_p5 = scmp.ne.s32.totalorder %s27_s15, %s2052_s17  ;;  %p2058_p7 = scmp.lt.s32.totalorder %s2052_s17, %s2052_s17 }
  0x2f   :  { %p2059_p8 = por %p2058_p7, %p2057_p6 }
  0x31   :  { %p2060_p9 = pnand %p2059_p8, %p2053_p5 }
  0x33   :  { %2063 = shalt.err (!%p2060_p9)
}
  0x34   :  { %29 = dma.hbm_to_vmem [thread:$0]  %s2356_s0, 128, %s27_s15, [#allocation3]  }
  0x35   :  { %s2145_s19 = smov [#allocation6]   ;;  %s2146_s21 = smov [#allocation9]  }
  0x36   :  { %s49_s20 = sshll.u32 %s2145_s19, 4  ;;  %s77_s22 = sshll.u32 %s2146_s21, 4  ;;  %s50_s20 = int_to_ptr.vmem [resolvable:$true] %s49_s20  ;;  %s78_s22 = int_to_ptr.vmem [resolvable:$true] %s77_s22 }
  0x37   :  { %s2064_s25 = scalar_lea.hbm %s2359_s3, 8192 }
  0x38   :  { %p2065_p10 = scmp.ne.s32.totalorder %s2359_s3, %s2064_s25  ;;  %p2068_p11 = scmp.lt.u32.totalorder %s2064_s25, %s2359_s3 }
  0x3a   :  { %p2070_p12 = pnand %p2068_p11, %p2065_p10 }
  0x3c   :  { %2073 = shalt.err (!%p2070_p12)
}
  0x3d   :  { %s2074_s0 = scalar_lea.vmem %s50_s20, 8192  ;;  %p2079_p0 = scmp.lt.s32.totalorder %s50_s20, %s50_s20 }
  0x3e   :  { %p2075_p13 = scmp.ne.s32.totalorder %s50_s20, %s2074_s0  ;;  %p2080_p1 = scmp.lt.s32.totalorder %s2074_s0, %s2074_s0 }
  0x40   :  { %p2081_p2 = por %p2080_p1, %p2079_p0 }
  0x42   :  { %p2082_p3 = pnand %p2081_p2, %p2075_p13 }
  0x44   :  { %2085 = shalt.err (!%p2082_p3)
}
  0x45   :  { %55 = dma.hbm_to_vmem [thread:$0]  %s2359_s3, 8192, %s50_s20, [#allocation5], %s2143_s18, %s2143_s18, %s2144_s24  }
  0x46   :  { %s2086_s16 = scalar_lea.hbm %s2363_s7, 2048 }
  0x47   :  { %p2087_p4 = scmp.ne.s32.totalorder %s2363_s7, %s2086_s16  ;;  %p2090_p5 = scmp.lt.u32.totalorder %s2086_s16, %s2363_s7 }
  0x49   :  { %p2092_p6 = pnand %p2090_p5, %p2087_p4 }
  0x4b   :  { %2095 = shalt.err (!%p2092_p6)
}
  0x4c   :  { %s2096_s21 = scalar_lea.vmem %s78_s22, 2048  ;;  %p2101_p8 = scmp.lt.s32.totalorder %s78_s22, %s78_s22 }
  0x4d   :  { %p2097_p7 = scmp.ne.s32.totalorder %s78_s22, %s2096_s21  ;;  %p2102_p9 = scmp.lt.s32.totalorder %s2096_s21, %s2096_s21 }
  0x4f   :  { %p2103_p10 = por %p2102_p9, %p2101_p8 }
  0x51   :  { %p2104_p11 = pnand %p2103_p10, %p2097_p7 }
  0x53   :  { %2107 = shalt.err (!%p2104_p11)
}
  0x54   :  { %s2147_s3 = smov 64   ;;  %s2148_s18 = smov 4  }
  0x55   :  { %83 = dma.hbm_to_vmem [thread:$0]  %s2363_s7, 2048, %s78_s22, [#allocation8], %s2147_s3, %s2147_s3, %s2148_s18  }
  0x56   :  { %s2149_s23 = smov [#allocation10]   ;;  %s2108_s27 = scalar_lea.hbm %s2365_s9, 1024 }
  0x57   :  { %s91_s1 = sshll.u32 %s2149_s23, 4  ;;  %p2109_p12 = scmp.ne.s32.totalorder %s2365_s9, %s2108_s27  ;;  %s92_s1 = int_to_ptr.vmem [resolvable:$true] %s91_s1 }
  0x58   :  { %p2112_p13 = scmp.lt.u32.totalorder %s2108_s27, %s2365_s9 }
  0x5a   :  { %p2114_p0 = pnand %p2112_p13, %p2109_p12 }
  0x5c   :  { %2117 = shalt.err (!%p2114_p0)
}
  0x5d   :  { %s2118_s30 = scalar_lea.vmem %s92_s1, 1024  ;;  %p2123_p2 = scmp.lt.s32.totalorder %s92_s1, %s92_s1 }
  0x5e   :  { %p2119_p1 = scmp.ne.s32.totalorder %s92_s1, %s2118_s30  ;;  %p2124_p3 = scmp.lt.s32.totalorder %s2118_s30, %s2118_s30 }
  0x60   :  { %p2125_p4 = por %p2124_p3, %p2123_p2 }
  0x62   :  { %p2126_p5 = pnand %p2125_p4, %p2119_p1 }
  0x64   :  { %2129 = shalt.err (!%p2126_p5)
}
  0x65   :  { %97 = dma.hbm_to_vmem [thread:$0]  %s2365_s9, 1024, %s92_s1, [#allocation11], %s2147_s3, %s2147_s3, %s2148_s18  }
  0x66   :  { %2130 = dma.done.wait [#allocation3], 128  }
  0x67   :  { %2131 = vsyncadd [#allocation3], 4294967168 }
  0x68   :  { %2132 = dma.done.wait [#allocation5], 12032  }
  0x69   :  { %2133 = vsyncadd [#allocation5], 4294955264 }
  0x6a   :  { %2134 = dma.done.wait [#allocation8], 6144  }
  0x6b   :  { %2135 = vsyncadd [#allocation8], 4294961152 }
  0x6c   :  { %2136 = dma.done.wait [#allocation11], 1024  }
  0x6d   :  { %2137 = vsyncadd [#allocation11], 4294966272  ;;  %v2150_v0 = vmov 0   ;;  %v1784_v1 = vld [vmem:[#allocation4 + $0x4] ss:$16 sps:$4 sm:$0xff]   ;;  %vm305_vm0 = vcmask 1043456  }
  0x6e   :  { %350 = vmatprep.mubr.bf16.mxu0 %v2150_v0  ;;  %391 = vmatprep.mubr.bf16.mxu1 %v2150_v0  ;;  %v1786_v2 = vld [vmem:[#allocation4] ss:$16 sps:$4 sm:$0xff]   ;;  %v1787_v3 = vld [vmem:[#allocation4 + $0x24] ss:$16 sps:$4 sm:$0xff]   ;;  %v1807_v9 = vld [vmem:[#allocation4 + $0xc] ss:$16 sps:$4 sm:$0xff]  }
  0x6f   :  { %318 = vmatprep.subr.bf16.mxu0 %v1784_v1  ;;  %v1789_v4 = vld [vmem:[#allocation4 + $0x20] ss:$16 sps:$4 sm:$0xff]   ;;  %v1790_v5 = vld [vmem:[#allocation4 + $0x44] ss:$16 sps:$4 sm:$0xff]   ;;  %v1809_v10 = vld [vmem:[#allocation4 + $0x8] ss:$16 sps:$4 sm:$0xff]   ;;  %359 = vmatprep.subr.bf16.mxu1 %v1807_v9 }
  0x70   :  { %319 = vmatpush1.bf16.msra.mxu0 %v1786_v2  ;;  %v1792_v6 = vld [vmem:[#allocation4 + $0x40] ss:$16 sps:$4 sm:$0xff]   ;;  %v1793_v7 = vld [vmem:[#allocation4 + $0x64] ss:$16 sps:$4 sm:$0xff]   ;;  %v1810_v12 = vld [vmem:[#allocation4 + $0x2c] ss:$16 sps:$4 sm:$0xff]   ;;  %360 = vmatpush1.bf16.msra.mxu1 %v1809_v10 }
  0x71   :  { %320 = vmatprep.subr.bf16.mxu0 %v1787_v3  ;;  %v1795_v8 = vld [vmem:[#allocation4 + $0x60] ss:$16 sps:$4 sm:$0xff]   ;;  %v1796_v11 = vld [vmem:[#allocation4 + $0x84] ss:$16 sps:$4 sm:$0xff]   ;;  %v1812_v13 = vld [vmem:[#allocation4 + $0x28] ss:$16 sps:$4 sm:$0xff]   ;;  %361 = vmatprep.subr.bf16.mxu1 %v1810_v12 }
  0x72   :  { %v1813_v14 = vld [vmem:[#allocation4 + $0x4c] ss:$16 sps:$4 sm:$0xff]   ;;  %v1798_v15 = vld [vmem:[#allocation4 + $0x80] ss:$16 sps:$4 sm:$0xff]   ;;  %v1799_v16 = vld [vmem:[#allocation4 + $0xa4] ss:$16 sps:$4 sm:$0xff]  }
  0x73   :  { %v1815_v17 = vld [vmem:[#allocation4 + $0x48] ss:$16 sps:$4 sm:$0xff]   ;;  %v1816_v18 = vld [vmem:[#allocation4 + $0x6c] ss:$16 sps:$4 sm:$0xff]   ;;  %v1801_v19 = vld [vmem:[#allocation4 + $0xa0] ss:$16 sps:$4 sm:$0xff]  }
  0x74   :  { %321 = vmatpush1.bf16.msra.mxu0 %v1789_v4  ;;  %362 = vmatpush1.bf16.msra.mxu1 %v1812_v13  ;;  %v1802_v20 = vld [vmem:[#allocation4 + $0xc4] ss:$16 sps:$4 sm:$0xff]   ;;  %v1818_v22 = vld [vmem:[#allocation4 + $0x68] ss:$16 sps:$4 sm:$0xff]   ;;  %v1819_v23 = vld [vmem:[#allocation4 + $0x8c] ss:$16 sps:$4 sm:$0xff]  }
  0x75   :  { %322 = vmatprep.subr.bf16.mxu0 %v1790_v5  ;;  %363 = vmatprep.subr.bf16.mxu1 %v1813_v14  ;;  %v149_v21 = vld [vmem:[#allocation4 + $0xe0] sm:$0xff]  ;;  %v1821_v27 = vld [vmem:[#allocation4 + $0x88] ss:$16 sps:$4 sm:$0xff]   ;;  %v1822_v28 = vld [vmem:[#allocation4 + $0xac] ss:$16 sps:$4 sm:$0xff]   ;;  %vm301_vm1 = vcmask 982016  }
  0x76   :  { %v1804_v24 = vld [vmem:[#allocation4 + $0xc0] ss:$16 sps:$4 sm:$0xff]   ;;  %v1582_v25 = vcombine.high %v149_v21, %v149_v21  ;;  %v1581_v26 = vcombine.low %v149_v21, %v149_v21  ;;  %v119_v29 = vld [vmem:[#allocation2] sm:$0xff]  ;;  %v150_v35 = vld [vmem:[#allocation4 + $0xe8] sm:$0xff]  ;;  %vm2153_vm2 = vmmov 0   ;;  %vm1543_vm3 = vcmask 15360  }
  0x77   :  { %v1832_v31 = vld [vmem:[#allocation6 + $0x4] ss:$8 sps:$4 sm:$0xff]   ;;  %v1824_v32 = vld [vmem:[#allocation4 + $0xa8] ss:$16 sps:$4 sm:$0xff]   ;;  %v120_v33 = vpack.c.bf16 %v119_v29, %v119_v29  ;;  %v1835_v37 = vld [vmem:[#allocation6 + $0x14] ss:$8 sps:$4 sm:$0xff]   ;;  %v1584_v39 = vcombine.high %v150_v35, %v150_v35  ;;  %v1583_v40 = vcombine.low %v150_v35, %v150_v35 }
  0x78   :  { %323 = vmatpush1.bf16.msra.mxu0 %v1792_v6  ;;  %364 = vmatpush1.bf16.msra.mxu1 %v1815_v17  ;;  %v307_v30 = vsel %vm305_vm0, %v1581_v26, 0  ;;  %v1825_v34 = vld [vmem:[#allocation4 + $0xcc] ss:$16 sps:$4 sm:$0xff]   ;;  %v1830_v36 = vld [vmem:[#allocation6] ss:$8 sps:$4 sm:$0xff]  }
  0x79   :  { %324 = vmatprep.subr.bf16.mxu0 %v1793_v7  ;;  %365 = vmatprep.subr.bf16.mxu1 %v1816_v18  ;;  %v1827_v38 = vld [vmem:[#allocation4 + $0xc8] ss:$16 sps:$4 sm:$0xff]   ;;  %v1838_v42 = vld [vmem:[#allocation6 + $0x24] ss:$8 sps:$4 sm:$0xff]   ;;  %v313_v44 = vsel %vm305_vm0, %v1583_v40, 0 }
  0x7a   :  { %v1833_v41 = vld [vmem:[#allocation6 + $0x10] ss:$8 sps:$4 sm:$0xff]   ;;  %v1836_v43 = vld [vmem:[#allocation6 + $0x20] ss:$8 sps:$4 sm:$0xff]   ;;  %v1841_v45 = vld [vmem:[#allocation6 + $0x34] ss:$8 sps:$4 sm:$0xff]  }
  0x7b   :  { %v1839_v46 = vld [vmem:[#allocation6 + $0x30] ss:$8 sps:$4 sm:$0xff]   ;;  %v1844_v47 = vld [vmem:[#allocation6 + $0x44] ss:$8 sps:$4 sm:$0xff]   ;;  %v1842_v48 = vld [vmem:[#allocation6 + $0x40] ss:$8 sps:$4 sm:$0xff]  }
  0x7c   :  { %325 = vmatpush1.bf16.msra.mxu0 %v1795_v8  ;;  %366 = vmatpush1.bf16.msra.mxu1 %v1818_v22  ;;  %v1847_v49 = vld [vmem:[#allocation6 + $0x54] ss:$8 sps:$4 sm:$0xff]   ;;  %v1845_v50 = vld [vmem:[#allocation6 + $0x50] ss:$8 sps:$4 sm:$0xff]   ;;  %v1850_v51 = vld [vmem:[#allocation6 + $0x64] ss:$8 sps:$4 sm:$0xff]  }
  0x7d   :  { %326 = vmatprep.subr.bf16.mxu0 %v1796_v11  ;;  %367 = vmatprep.subr.bf16.mxu1 %v1819_v23  ;;  %v1848_v52 = vld [vmem:[#allocation6 + $0x60] ss:$8 sps:$4 sm:$0xff]   ;;  %v1853_v53 = vld [vmem:[#allocation6 + $0x74] ss:$8 sps:$4 sm:$0xff]   ;;  %v1851_v54 = vld [vmem:[#allocation6 + $0x70] ss:$8 sps:$4 sm:$0xff]  }
  0x7e   :  { %v1856_v55 = vld [vmem:[#allocation6 + $0x84] ss:$8 sps:$4 sm:$0xff]   ;;  %v1854_v56 = vld [vmem:[#allocation6 + $0x80] ss:$8 sps:$4 sm:$0xff]   ;;  %v1859_v57 = vld [vmem:[#allocation6 + $0x94] ss:$8 sps:$4 sm:$0xff]  }
  0x7f   :  { %v1857_v58 = vld [vmem:[#allocation6 + $0x90] ss:$8 sps:$4 sm:$0xff]   ;;  %v1862_v59 = vld [vmem:[#allocation6 + $0xa4] ss:$8 sps:$4 sm:$0xff]   ;;  %v1860_v60 = vld [vmem:[#allocation6 + $0xa0] ss:$8 sps:$4 sm:$0xff]  }
  0x80   :  { %327 = vmatpush1.bf16.msra.mxu0 %v1798_v15  ;;  %368 = vmatpush1.bf16.msra.mxu1 %v1821_v27  ;;  %v1865_v61 = vld [vmem:[#allocation6 + $0xb4] ss:$8 sps:$4 sm:$0xff]   ;;  %v1863_v62 = vld [vmem:[#allocation6 + $0xb0] ss:$8 sps:$4 sm:$0xff]   ;;  %v1868_v63 = vld [vmem:[#allocation6 + $0xc4] ss:$8 sps:$4 sm:$0xff]  }
  0x81   :  { %328 = vmatprep.subr.bf16.mxu0 %v1799_v16  ;;  %369 = vmatprep.subr.bf16.mxu1 %v1822_v28  ;;  %v1866_v1 = vld [vmem:[#allocation6 + $0xc0] ss:$8 sps:$4 sm:$0xff]   ;;  %v1871_v2 = vld [vmem:[#allocation6 + $0xd4] ss:$8 sps:$4 sm:$0xff]   ;;  %v1869_v3 = vld [vmem:[#allocation6 + $0xd0] ss:$8 sps:$4 sm:$0xff]  }
  0x82   :  { %v1874_v4 = vld [vmem:[#allocation6 + $0xe4] ss:$8 sps:$4 sm:$0xff]   ;;  %v1872_v5 = vld [vmem:[#allocation6 + $0xe0] ss:$8 sps:$4 sm:$0xff]   ;;  %v1877_v6 = vld [vmem:[#allocation6 + $0xf4] ss:$8 sps:$4 sm:$0xff]  }
  0x83   :  { %v1875_v7 = vld [vmem:[#allocation6 + $0xf0] ss:$8 sps:$4 sm:$0xff]   ;;  %v1880_v8 = vld [vmem:[#allocation6 + $0x104] ss:$8 sps:$4 sm:$0xff]   ;;  %v1926_v9 = vld [vmem:[#allocation7] ss:$8 sps:$4 sm:$0xff]  }
  0x84   :  { %329 = vmatpush1.bf16.msra.mxu0 %v1801_v19  ;;  %370 = vmatpush1.bf16.msra.mxu1 %v1824_v32  ;;  %v1928_v10 = vld [vmem:[#allocation7 + $0x4] ss:$8 sps:$4 sm:$0xff]   ;;  %v1931_v11 = vld [vmem:[#allocation7 + $0x14] ss:$8 sps:$4 sm:$0xff]   ;;  %v1929_v12 = vld [vmem:[#allocation7 + $0x10] ss:$8 sps:$4 sm:$0xff]  }
  0x85   :  { %330 = vmatprep.subr.bf16.mxu0 %v1802_v20  ;;  %371 = vmatprep.subr.bf16.mxu1 %v1825_v34  ;;  %v1934_v13 = vld [vmem:[#allocation7 + $0x24] ss:$8 sps:$4 sm:$0xff]   ;;  %v1932_v14 = vld [vmem:[#allocation7 + $0x20] ss:$8 sps:$4 sm:$0xff]   ;;  %v1937_v15 = vld [vmem:[#allocation7 + $0x34] ss:$8 sps:$4 sm:$0xff]  }
  0x86   :  { %v1935_v16 = vld [vmem:[#allocation7 + $0x30] ss:$8 sps:$4 sm:$0xff]   ;;  %v1940_v17 = vld [vmem:[#allocation7 + $0x44] ss:$8 sps:$4 sm:$0xff]   ;;  %v1938_v18 = vld [vmem:[#allocation7 + $0x40] ss:$8 sps:$4 sm:$0xff]  }
  0x87   :  { %v1943_v19 = vld [vmem:[#allocation7 + $0x54] ss:$8 sps:$4 sm:$0xff]   ;;  %v1941_v20 = vld [vmem:[#allocation7 + $0x50] ss:$8 sps:$4 sm:$0xff]   ;;  %v1946_v21 = vld [vmem:[#allocation7 + $0x64] ss:$8 sps:$4 sm:$0xff]  }
  0x88   :  { %331 = vmatpush1.bf16.msra.mxu0 %v1804_v24  ;;  %372 = vmatpush1.bf16.msra.mxu1 %v1827_v38  ;;  %v1944_v22 = vld [vmem:[#allocation7 + $0x60] ss:$8 sps:$4 sm:$0xff]   ;;  %v1949_v23 = vld [vmem:[#allocation7 + $0x74] ss:$8 sps:$4 sm:$0xff]   ;;  %v1947_v24 = vld [vmem:[#allocation7 + $0x70] ss:$8 sps:$4 sm:$0xff]  }
  0x89   :  { %1585 = vmatprep.subr.msk.bf16.mxu0 %vm305_vm0, %v1582_v25  ;;  %1587 = vmatprep.subr.msk.bf16.mxu1 %vm305_vm0, %v1584_v39  ;;  %v1952_v25 = vld [vmem:[#allocation7 + $0x84] ss:$8 sps:$4 sm:$0xff]   ;;  %v1950_v26 = vld [vmem:[#allocation7 + $0x80] ss:$8 sps:$4 sm:$0xff]   ;;  %v1955_v27 = vld [vmem:[#allocation7 + $0x94] ss:$8 sps:$4 sm:$0xff]  }
  0x8a   :  { %v2151_v28 = vmov 1966171168   ;;  %v1958_v32 = vld [vmem:[#allocation7 + $0xa4] ss:$8 sps:$4 sm:$0xff]   ;;  %v1956_v35 = vld [vmem:[#allocation7 + $0xa0] ss:$8 sps:$4 sm:$0xff]  }
  0x8b   :  { %v415_v29 = vunpack.c.l.s4 %v2151_v28  ;;  %v1959_v40 = vld [vmem:[#allocation7 + $0xb0] ss:$8 sps:$4 sm:$0xff]   ;;  %v1910_v28 = vld [vmem:[#allocation6 + $0x1a4] ss:$8 sps:$4 sm:$0xff]  }
  0x8c   :  { %333 = vmatpush1.bf16.msra.mxu0 %v307_v30  ;;  %374 = vmatpush1.bf16.msra.mxu1 %v313_v44  ;;  %v417_v30 = vlaneseq  ;;  %v1962_v44 = vld [vmem:[#allocation7 + $0xc0] ss:$8 sps:$4 sm:$0xff]  }
  0x8d   :  { %850 = vmatprep.subr.bf16.mxu0 %v1832_v31  ;;  %1168 = vmatprep.subr.bf16.mxu1 %v1928_v10  ;;  %v1953_v31 = vld [vmem:[#allocation7 + $0x90] ss:$8 sps:$4 sm:$0xff]  }
  0x8e   :  { %v418_v34 = vshrl.u32 %v417_v30, 7  ;;  %v1913_v30 = vld [vmem:[#allocation6 + $0x1b4] ss:$8 sps:$4 sm:$0xff]  }
  0x8f   :  { %1586 = vmatmul.mubr.msk.bf16.vlgmr.msra.gmra.mrb[0].mxu0 %vm301_vm1, %v120_v33  ;;  %1588 = vmatmul.mubr.msk.bf16.vlgmr.msra.gmra.mrb[0].mxu1 %vm301_vm1, %v120_v33  ;;  %v416_v33 = vunpack.c.0.s8 %v415_v29  ;;  %v1908_v29 = vld [vmem:[#allocation6 + $0x1a0] ss:$8 sps:$4 sm:$0xff]  }
  0x90   :  { %851 = vmatpush1.bf16.msra.mxu0 %v1830_v36  ;;  %1169 = vmatpush1.bf16.msra.mxu1 %v1926_v9  ;;  %v1589_v36 = vld.sshfl [vmem:[%s2358_s2] sm:$0x33 pattern:$0x75316420] }
  0x91   :  { %852 = vmatprep.subr.bf16.mxu0 %v1835_v37  ;;  %1170 = vmatprep.subr.bf16.mxu1 %v1931_v11  ;;  %v1961_v37 = vld [vmem:[#allocation7 + $0xb4] ss:$8 sps:$4 sm:$0xff]   ;;  %v2303_v38 = vsub.s32 %v416_v33, %v418_v34  ;;  %v413_v39 = vcombine.high %v1589_v36, %v1589_v36  ;;  %v1884_v11 = vld [vmem:[#allocation6 + $0x120] ss:$8 sps:$4 sm:$0xff]  }
  0x92   :  { %v1914_v33 = vld [vmem:[#allocation6 + $0x1c0] ss:$8 sps:$4 sm:$0xff]  }
  0x94   :  { %853 = vmatpush1.bf16.msra.mxu0 %v1833_v41  ;;  %1171 = vmatpush1.bf16.msra.mxu1 %v1929_v12  ;;  %v1964_v41 = vld [vmem:[#allocation7 + $0xc4] ss:$8 sps:$4 sm:$0xff]  }
  0x95   :  { %854 = vmatprep.subr.bf16.mxu0 %v1838_v42  ;;  %1172 = vmatprep.subr.bf16.mxu1 %v1934_v13  ;;  %v2306_v42 = vrot.slane %v1589_v36, %v2303_v38  ;;  %v1889_v13 = vld [vmem:[#allocation6 + $0x134] ss:$8 sps:$4 sm:$0xff]   ;;  %v1917_v36 = vld [vmem:[#allocation6 + $0x1d0] ss:$8 sps:$4 sm:$0xff]  }
  0x98   :  { %855 = vmatpush1.bf16.msra.mxu0 %v1836_v43  ;;  %1173 = vmatpush1.bf16.msra.mxu1 %v1932_v14  ;;  %v427_v43 = vrot.slane %v413_v39, %v2303_v38  ;;  %v1922_v39 = vld [vmem:[#allocation6 + $0x1e4] ss:$8 sps:$4 sm:$0xff]  }
  0x99   :  { %856 = vmatprep.subr.bf16.mxu0 %v1841_v45  ;;  %1174 = vmatprep.subr.bf16.mxu1 %v1937_v15  ;;  %v1967_v45 = vld [vmem:[#allocation7 + $0xd4] ss:$8 sps:$4 sm:$0xff]   ;;  %v1887_v15 = vld [vmem:[#allocation6 + $0x130] ss:$8 sps:$4 sm:$0xff]  }
  0x9c   :  { %857 = vmatpush1.bf16.msra.mxu0 %v1839_v46  ;;  %1175 = vmatpush1.bf16.msra.mxu1 %v1935_v16  ;;  %v431_v46 = vpack.i.b16 %v2306_v42, %v2306_v42  ;;  %v1892_v16 = vld [vmem:[#allocation6 + $0x144] ss:$8 sps:$4 sm:$0xff]  }
  0x9d   :  { %858 = vmatprep.subr.bf16.mxu0 %v1844_v47  ;;  %1176 = vmatprep.subr.bf16.mxu1 %v1940_v17  ;;  %v2311_v47 = vsub.s32 0, %v418_v34  ;;  %v1890_v17 = vld [vmem:[#allocation6 + $0x140] ss:$8 sps:$4 sm:$0xff]   ;;  %v428_v34 = vcombine.high %v2306_v42, %v2306_v42 }
  0xa0   :  { %859 = vmatpush1.bf16.msra.mxu0 %v1842_v48  ;;  %1177 = vmatpush1.bf16.msra.mxu1 %v1938_v18  ;;  %v438_v48 = vpack.i.b16 %v427_v43, %v427_v43  ;;  %v1895_v18 = vld [vmem:[#allocation6 + $0x154] ss:$8 sps:$4 sm:$0xff]  }
  0xa1   :  { %860 = vmatprep.subr.bf16.mxu0 %v1847_v49  ;;  %1178 = vmatprep.subr.bf16.mxu1 %v1943_v19  ;;  %v1965_v49 = vld [vmem:[#allocation7 + $0xd0] ss:$8 sps:$4 sm:$0xff]  }
  0xa2   :  { %v1893_v19 = vld [vmem:[#allocation6 + $0x150] ss:$8 sps:$4 sm:$0xff]  }
  0xa4   :  { %861 = vmatpush1.bf16.msra.mxu0 %v1845_v50  ;;  %1179 = vmatpush1.bf16.msra.mxu1 %v1941_v20  ;;  %v436_v50 = vrot.slane %v431_v46, %v2311_v47  ;;  %v1898_v20 = vld [vmem:[#allocation6 + $0x164] ss:$8 sps:$4 sm:$0xff]  }
  0xa5   :  { %862 = vmatprep.subr.bf16.mxu0 %v1850_v51  ;;  %1180 = vmatprep.subr.bf16.mxu1 %v1946_v21  ;;  %v1896_v21 = vld [vmem:[#allocation6 + $0x160] ss:$8 sps:$4 sm:$0xff]  }
  0xa8   :  { %863 = vmatpush1.bf16.msra.mxu0 %v1848_v52  ;;  %1181 = vmatpush1.bf16.msra.mxu1 %v1944_v22  ;;  %v443_v52 = vrot.slane %v438_v48, %v2311_v47  ;;  %v1901_v22 = vld [vmem:[#allocation6 + $0x174] ss:$8 sps:$4 sm:$0xff]   ;;  %v1970_v48 = vld [vmem:[#allocation7 + $0xe4] ss:$8 sps:$4 sm:$0xff]  }
  0xa9   :  { %864 = vmatprep.subr.bf16.mxu0 %v1853_v53  ;;  %1182 = vmatprep.subr.bf16.mxu1 %v1949_v23  ;;  %v1899_v23 = vld [vmem:[#allocation6 + $0x170] ss:$8 sps:$4 sm:$0xff]  }
  0xac   :  { %865 = vmatpush1.bf16.msra.mxu0 %v1851_v54  ;;  %1183 = vmatpush1.bf16.msra.mxu1 %v1947_v24  ;;  %v1904_v24 = vld [vmem:[#allocation6 + $0x184] ss:$8 sps:$4 sm:$0xff]  }
  0xad   :  { %866 = vmatprep.subr.bf16.mxu0 %v1856_v55  ;;  %1184 = vmatprep.subr.bf16.mxu1 %v1952_v25  ;;  %v1902_v25 = vld [vmem:[#allocation6 + $0x180] ss:$8 sps:$4 sm:$0xff]  }
  0xb0   :  { %867 = vmatpush1.bf16.msra.mxu0 %v1854_v56  ;;  %1185 = vmatpush1.bf16.msra.mxu1 %v1950_v26  ;;  %v1907_v26 = vld [vmem:[#allocation6 + $0x194] ss:$8 sps:$4 sm:$0xff]  }
  0xb1   :  { %868 = vmatprep.subr.bf16.mxu0 %v1859_v57  ;;  %1186 = vmatprep.subr.bf16.mxu1 %v1955_v27  ;;  %v429_v57 = vcombine.high %v427_v43, %v427_v43  ;;  %v1905_v27 = vld [vmem:[#allocation6 + $0x190] ss:$8 sps:$4 sm:$0xff]  }
  0xb4   :  { %869 = vmatpush1.bf16.msra.mxu0 %v1857_v58  ;;  %1187 = vmatpush1.bf16.msra.mxu1 %v1953_v31  ;;  %v1911_v31 = vld [vmem:[#allocation6 + $0x1b0] ss:$8 sps:$4 sm:$0xff]  }
  0xb5   :  { %870 = vmatprep.subr.bf16.mxu0 %v1862_v59  ;;  %1188 = vmatprep.subr.bf16.mxu1 %v1958_v32  ;;  %v1916_v32 = vld [vmem:[#allocation6 + $0x1c4] ss:$8 sps:$4 sm:$0xff]  }
  0xb8   :  { %871 = vmatpush1.bf16.msra.mxu0 %v1860_v60  ;;  %1189 = vmatpush1.bf16.msra.mxu1 %v1956_v35  ;;  %v1919_v35 = vld [vmem:[#allocation6 + $0x1d4] ss:$8 sps:$4 sm:$0xff]  }
  0xb9   :  { %872 = vmatprep.subr.bf16.mxu0 %v1865_v61  ;;  %1190 = vmatprep.subr.bf16.mxu1 %v1961_v37  ;;  %v445_v37 = vpack.i.b16 %v428_v34, %v428_v34 }
  0xbb   :  { %v450_v43 = vrot.slane %v445_v37, %v2311_v47 }
  0xbc   :  { %873 = vmatpush1.bf16.msra.mxu0 %v1863_v62  ;;  %1191 = vmatpush1.bf16.msra.mxu1 %v1959_v40  ;;  %v1878_v62 = vld [vmem:[#allocation6 + $0x100] ss:$8 sps:$4 sm:$0xff]  }
  0xbd   :  { %874 = vmatprep.subr.bf16.mxu0 %v1868_v63  ;;  %1192 = vmatprep.subr.bf16.mxu1 %v1964_v41  ;;  %v452_v63 = vpack.i.b16 %v429_v57, %v429_v57  ;;  %v1920_v40 = vld [vmem:[#allocation6 + $0x1e0] ss:$8 sps:$4 sm:$0xff]  }
  0xc0   :  { %875 = vmatpush1.bf16.msra.mxu0 %v1866_v1  ;;  %1193 = vmatpush1.bf16.msra.mxu1 %v1962_v44  ;;  %v1925_v44 = vld [vmem:[#allocation6 + $0x1f4] ss:$8 sps:$4 sm:$0xff]  }
  0xc1   :  { %876 = vmatprep.subr.bf16.mxu0 %v1871_v2  ;;  %1194 = vmatprep.subr.bf16.mxu1 %v1967_v45  ;;  %v1883_v2 = vld [vmem:[#allocation6 + $0x114] ss:$8 sps:$4 sm:$0xff]   ;;  %v1923_v45 = vld [vmem:[#allocation6 + $0x1f0] ss:$8 sps:$4 sm:$0xff]  }
  0xc4   :  { %877 = vmatpush1.bf16.msra.mxu0 %v1869_v3  ;;  %1195 = vmatpush1.bf16.msra.mxu1 %v1965_v49  ;;  %v1881_v3 = vld [vmem:[#allocation6 + $0x110] ss:$8 sps:$4 sm:$0xff]   ;;  %v1968_v49 = vld [vmem:[#allocation7 + $0xe0] ss:$8 sps:$4 sm:$0xff]  }
  0xc5   :  { %878 = vmatprep.subr.bf16.mxu0 %v1874_v4  ;;  %1196 = vmatprep.subr.bf16.mxu1 %v1970_v48  ;;  %v1995_v48 = vld [vmem:[#allocation10 + $0x28] sm:$0xff]  }
  0xc8   :  { %879 = vmatpush1.bf16.msra.mxu0 %v1872_v5  ;;  %v457_v5 = vrot.slane %v452_v63, %v2311_v47  ;;  %1197 = vmatpush1.bf16.msra.mxu1 %v1968_v49  ;;  %v1996_v49 = vld [vmem:[#allocation10 + $0x30] sm:$0xff]  }
  0xc9   :  { %880 = vmatprep.subr.bf16.mxu0 %v1877_v6  ;;  %v1886_v6 = vld [vmem:[#allocation6 + $0x124] ss:$8 sps:$4 sm:$0xff]  }
  0xcc   :  { %881 = vmatpush1.bf16.msra.mxu0 %v1875_v7 }
  0xcd   :  { %891 = vmatprep.subr.bf16.mxu0 %v1880_v8 }
 0x162   :  { %v352_v51 = vpop.f32.mrb[0].mxu0  ;;  %v2317_v4 = vpop.f32.mrb[0].mxu1 }
 0x163   :  { %v401_v53 = vpack.c.bf16 %v352_v51, %v352_v51  ;;  %v354_v54 = vpop.f32.mrb[1].mxu0  ;;  %v395_v7 = vpop.f32.mrb[1].mxu1  ;;  %v403_v41 = vpack.c.bf16 %v2317_v4, %v2317_v4  ;;  %v1971_v51 = vld [vmem:[#allocation7 + $0xf0] ss:$8 sps:$4 sm:$0xff]  }
 0x164   :  { %v402_v55 = vpack.c.bf16 %v354_v54, %v354_v54  ;;  %v356_v56 = vpop.f32.mrb[2].mxu0  ;;  %v404_v8 = vpack.c.bf16 %v395_v7, %v395_v7  ;;  %v397_v9 = vpop.f32.mrb[2].mxu1  ;;  %v1975_v7 = vld [vmem:[#allocation9] sm:$0xff]  }
 0x165   :  { %v458_v58 = vadd.bf16 %v436_v50, %v401_v53  ;;  %v357_v59 = vpop.f32.mrb[3].mxu0  ;;  %v398_v10 = vpop.f32.mrb[3].mxu1  ;;  %v460_v46 = vadd.bf16 %v450_v43, %v403_v41  ;;  %v1973_v50 = vld [vmem:[#allocation7 + $0xf4] ss:$8 sps:$4 sm:$0xff]   ;;  %v1976_v9 = vld [vmem:[#allocation9 + $0x48] sm:$0xff]   ;;  %v1990_v43 = vld [vmem:[#allocation10] sm:$0xff]  }
 0x166   :  { %v459_v60 = vadd.bf16 %v443_v52, %v402_v55  ;;  %v461_v12 = vadd.bf16 %v457_v5, %v404_v8  ;;  %1198 = vmatprep.subr.bf16.mxu1 %v1973_v50  ;;  %v1974_v52 = vld [vmem:[#allocation9 + $0x40] sm:$0xff]   ;;  %v1977_v10 = vld [vmem:[#allocation9 + $0x8] sm:$0xff]   ;;  %v1997_v50 = vld [vmem:[#allocation10 + $0x38] sm:$0xff]  }
 0x167   :  { %v462_v1 = vmax.bf16 %v2150_v0, %v458_v58  ;;  %v464_v42 = vmax.bf16 %v2150_v0, %v460_v46  ;;  %1199 = vmatpush1.bf16.msra.mxu1 %v1971_v51  ;;  %v1654_v53 = vld.sshfl [vmem:[%s2360_s4] sm:$0x11 pattern:$0x75316420]  ;;  %v1993_v46 = vld [vmem:[#allocation10 + $0x18] sm:$0xff]  }
 0x168   :  { %v463_v61 = vmax.bf16 %v2150_v0, %v459_v60  ;;  %v465_v14 = vmax.bf16 %v2150_v0, %v461_v12  ;;  %1713 = vmatprep.subr.bf16.mxu1 %v1974_v52  ;;  %v943_v54 = vcombine.high %v1654_v53, %v1654_v53  ;;  %v950_v55 = vrot.slane %v1654_v53, %v2303_v38  ;;  %v1979_v12 = vld [vmem:[#allocation9 + $0x10] sm:$0xff]   ;;  %v1421_v51 = vld [vmem:[%s2364_s8] sm:$0x1] }
 0x169   :  { %v1424_v52 = vpack.i.b16 %v1421_v51, %v1421_v51 }
 0x16a   :  { %882 = vmatprep.mubr.bf16.mxu0 %v463_v61  ;;  %v957_v56 = vrot.slane %v943_v54, %v2303_v38  ;;  %v959_v57 = vpack.i.b16 %v950_v55, %v950_v55 }
 0x16b   :  { %883 = vmatmul.mubr.bf16.vlgmr.msra.gmra.mrb[4].mxu0 %v462_v1 }
 0x16c   :  { %892 = vmatpush1.bf16.msra.mxu0 %v1878_v62  ;;  %923 = vmatprep.mubr.bf16.mxu0 %v465_v14  ;;  %v966_v58 = vpack.i.b16 %v957_v56, %v957_v56  ;;  %v964_v59 = vrot.slane %v959_v57, %v2311_v47  ;;  %v1981_v14 = vld [vmem:[#allocation9 + $0x18] sm:$0xff]   ;;  %v1429_v56 = vrot.slane %v1424_v52, %v2311_v47 }
 0x16d   :  { %893 = vmatprep.subr.bf16.mxu0 %v1883_v2 }
 0x16e   :  { %v971_v61 = vrot.slane %v966_v58, %v2311_v47 }
 0x170   :  { %894 = vmatpush1.bf16.msra.mxu0 %v1881_v3 }
 0x171   :  { %895 = vmatprep.subr.bf16.mxu0 %v1886_v6 }
 0x174   :  { %896 = vmatpush1.bf16.msra.mxu0 %v1884_v11  ;;  %v1978_v11 = vld [vmem:[#allocation9 + $0x50] sm:$0xff]  }
 0x175   :  { %897 = vmatprep.subr.bf16.mxu0 %v1889_v13  ;;  %v1980_v13 = vld [vmem:[#allocation9 + $0x58] sm:$0xff]  }
 0x178   :  { %898 = vmatpush1.bf16.msra.mxu0 %v1887_v15  ;;  %v1982_v15 = vld [vmem:[#allocation9 + $0x60] sm:$0xff]  }
 0x179   :  { %899 = vmatprep.subr.bf16.mxu0 %v1892_v16  ;;  %v1983_v16 = vld [vmem:[#allocation9 + $0x20] sm:$0xff]  }
 0x17c   :  { %900 = vmatpush1.bf16.msra.mxu0 %v1890_v17  ;;  %v1984_v17 = vld [vmem:[#allocation9 + $0x68] sm:$0xff]  }
 0x17d   :  { %901 = vmatprep.subr.bf16.mxu0 %v1895_v18  ;;  %v1985_v18 = vld [vmem:[#allocation9 + $0x28] sm:$0xff]  }
 0x180   :  { %902 = vmatpush1.bf16.msra.mxu0 %v1893_v19  ;;  %v1986_v19 = vld [vmem:[#allocation9 + $0x70] sm:$0xff]  }
 0x181   :  { %903 = vmatprep.subr.bf16.mxu0 %v1898_v20  ;;  %v1987_v20 = vld [vmem:[#allocation9 + $0x30] sm:$0xff]  }
 0x184   :  { %904 = vmatpush1.bf16.msra.mxu0 %v1896_v21  ;;  %v1988_v21 = vld [vmem:[#allocation9 + $0x78] sm:$0xff]  }
 0x185   :  { %905 = vmatprep.subr.bf16.mxu0 %v1901_v22  ;;  %v1989_v22 = vld [vmem:[#allocation9 + $0x38] sm:$0xff]  }
 0x188   :  { %906 = vmatpush1.bf16.msra.mxu0 %v1899_v23  ;;  %v2152_v23 = vmov 0.0  }
 0x189   :  { %907 = vmatprep.subr.bf16.mxu0 %v1904_v24  ;;  %v1687_v24 = vld.sshfl [vmem:[%s2362_s6] sm:$0x11 pattern:$0x75316420] }
 0x18c   :  { %908 = vmatpush1.bf16.msra.mxu0 %v1902_v25  ;;  %v1220_v25 = vcombine.high %v1687_v24, %v1687_v24 }
 0x18d   :  { %909 = vmatprep.subr.bf16.mxu0 %v1907_v26  ;;  %v1227_v26 = vrot.slane %v1687_v24, %v2303_v38 }
 0x190   :  { %910 = vmatpush1.bf16.msra.mxu0 %v1905_v27  ;;  %v1234_v27 = vrot.slane %v1220_v25, %v2303_v38  ;;  %v1991_v38 = vld [vmem:[#allocation10 + $0x8] sm:$0xff]  }
 0x191   :  { %911 = vmatprep.subr.bf16.mxu0 %v1910_v28  ;;  %v1236_v28 = vpack.i.b16 %v1227_v26, %v1227_v26 }
 0x194   :  { %912 = vmatpush1.bf16.msra.mxu0 %v1908_v29  ;;  %v1243_v29 = vpack.i.b16 %v1234_v27, %v1234_v27 }
 0x195   :  { %913 = vmatprep.subr.bf16.mxu0 %v1913_v30  ;;  %v1241_v30 = vrot.slane %v1236_v28, %v2311_v47 }
 0x198   :  { %914 = vmatpush1.bf16.msra.mxu0 %v1911_v31 }
 0x199   :  { %915 = vmatprep.subr.bf16.mxu0 %v1916_v32  ;;  %v1248_v32 = vrot.slane %v1243_v29, %v2311_v47 }
 0x19c   :  { %916 = vmatpush1.bf16.msra.mxu0 %v1914_v33 }
 0x19d   :  { %917 = vmatprep.subr.bf16.mxu0 %v1919_v35 }
 0x1a0   :  { %918 = vmatpush1.bf16.msra.mxu0 %v1917_v36 }
 0x1a1   :  { %919 = vmatprep.subr.bf16.mxu0 %v1922_v39 }
 0x1a4   :  { %920 = vmatpush1.bf16.msra.mxu0 %v1920_v40 }
 0x1a5   :  { %921 = vmatprep.subr.bf16.mxu0 %v1925_v44 }
 0x1a8   :  { %922 = vmatpush1.bf16.msra.mxu0 %v1923_v45  ;;  %v1992_v45 = vld [vmem:[#allocation10 + $0x10] sm:$0xff]  }
 0x1ab   :  { %924 = vmatmul.mubr.bf16.vlgmr.msra.gmra.mrb[4].mxu0 %v464_v42  ;;  %v1994_v42 = vld [vmem:[#allocation10 + $0x20] sm:$0xff]  }
 0x27e   :  { %v925_v60 = vpop.f32.mrb[4].mxu0 }
 0x27f   :  { %v933_v62 = vpack.c.bf16 %v925_v60, %v925_v60  ;;  %v927_v63 = vpop.f32.mrb[5].mxu0 }
 0x280   :  { %v934_v1 = vpack.c.bf16 %v927_v63, %v927_v63  ;;  %v929_v2 = vpop.f32.mrb[6].mxu0 }
 0x281   :  { %v972_v3 = vadd.bf16 %v964_v59, %v933_v62  ;;  %v930_v4 = vpop.f32.mrb[7].mxu0  ;;  %v1704_v62 = vld [vmem:[%s2366_s10] ss:$0 sm:$0xff] }
 0x282   :  { %v973_v5 = vadd.bf16 %v971_v61, %v934_v1 }
 0x283   :  { %v974_v8 = vmax.bf16 %v2150_v0, %v972_v3 }
 0x284   :  { %v975_v6 = vmax.bf16 %v2150_v0, %v973_v5 }
 0x286   :  { %1200 = vmatprep.mubr.bf16.mxu1 %v975_v6 }
 0x287   :  { %1201 = vmatmul.mubr.bf16.vlgmr.msra.gmra.mrb[4].mxu1 %v974_v8 }
 0x288   :  { %1714 = vmatpush3.bf16.msra.mxu1 %v1975_v7 }
 0x289   :  { %1715 = vmatprep.subr.bf16.mxu1 %v1976_v9 }
 0x28c   :  { %1716 = vmatpush3.bf16.msra.mxu1 %v1977_v10 }
 0x28d   :  { %1717 = vmatprep.subr.bf16.mxu1 %v1978_v11 }
 0x290   :  { %1718 = vmatpush3.bf16.msra.mxu1 %v1979_v12 }
 0x291   :  { %1719 = vmatprep.subr.bf16.mxu1 %v1980_v13 }
 0x294   :  { %1720 = vmatpush3.bf16.msra.mxu1 %v1981_v14 }
 0x295   :  { %1721 = vmatprep.subr.bf16.mxu1 %v1982_v15 }
 0x298   :  { %1722 = vmatpush3.bf16.msra.mxu1 %v1983_v16 }
 0x299   :  { %1723 = vmatprep.subr.bf16.mxu1 %v1984_v17 }
 0x29c   :  { %1724 = vmatpush3.bf16.msra.mxu1 %v1985_v18 }
 0x29d   :  { %1725 = vmatprep.subr.bf16.mxu1 %v1986_v19 }
 0x2a0   :  { %1726 = vmatpush3.bf16.msra.mxu1 %v1987_v20 }
 0x2a1   :  { %1727 = vmatprep.subr.bf16.mxu1 %v1988_v21 }
 0x2a4   :  { %1728 = vmatpush3.bf16.msra.mxu1 %v1989_v22 }
 0x2a5   :  { %1744 = vmatprep.subr.bf16.mxu1 %v2152_v23 }
 0x35a   :  { %v1202_v31 = vpop.f32.mrb[4].mxu1 }
 0x35b   :  { %v1210_v33 = vpack.c.bf16 %v1202_v31, %v1202_v31  ;;  %v1204_v34 = vpop.f32.mrb[5].mxu1 }
 0x35c   :  { %v1211_v35 = vpack.c.bf16 %v1204_v34, %v1204_v34  ;;  %v1206_v36 = vpop.f32.mrb[6].mxu1 }
 0x35d   :  { %v1249_v37 = vadd.bf16 %v1241_v30, %v1210_v33  ;;  %v1207_v39 = vpop.f32.mrb[7].mxu1 }
 0x35e   :  { %v1250_v40 = vadd.bf16 %v1248_v32, %v1211_v35 }
 0x35f   :  { %v1251_v44 = vmax.bf16 %v2150_v0, %v1249_v37 }
 0x360   :  { %v1252_v41 = vmax.bf16 %v2150_v0, %v1250_v40 }
 0x362   :  { %1413 = vmatprep.mubr.bf16.mxu1 %v1252_v41 }
 0x363   :  { %1414 = vmatmul.mubr.bf16.vlgmr.msra.gmra.mrb[8].mxu1 %v1251_v44 }
 0x364   :  { %1745 = vmatpush3.bf16.msra.mxu1 %v1990_v43  ;;  %1760 = vmatprep.mubr.msk.bf16.mxu1 %vm2153_vm2, %v2152_v23 }
 0x365   :  { %1746 = vmatprep.subr.bf16.mxu1 %v2152_v23 }
 0x368   :  { %1747 = vmatpush3.bf16.msra.mxu1 %v1991_v38 }
 0x369   :  { %1748 = vmatprep.subr.bf16.mxu1 %v2152_v23 }
 0x36c   :  { %1749 = vmatpush3.bf16.msra.mxu1 %v1992_v45 }
 0x36d   :  { %1750 = vmatprep.subr.bf16.mxu1 %v2152_v23 }
 0x370   :  { %1751 = vmatpush3.bf16.msra.mxu1 %v1993_v46 }
 0x371   :  { %1752 = vmatprep.subr.bf16.mxu1 %v2152_v23 }
 0x374   :  { %1753 = vmatpush3.bf16.msra.mxu1 %v1994_v42 }
 0x375   :  { %1754 = vmatprep.subr.bf16.mxu1 %v2152_v23 }
 0x378   :  { %1755 = vmatpush3.bf16.msra.mxu1 %v1995_v48 }
 0x379   :  { %1756 = vmatprep.subr.bf16.mxu1 %v2152_v23 }
 0x37c   :  { %1757 = vmatpush3.bf16.msra.mxu1 %v1996_v49 }
 0x37d   :  { %1758 = vmatprep.subr.bf16.mxu1 %v2152_v23 }
 0x380   :  { %1759 = vmatpush3.bf16.msra.mxu1 %v1997_v50 }
 0x436   :  { %v1729_v53 = vpop.f32.mrb[8].mxu1 }
 0x437   :  { %v1730_v54 = vpop.f32.mrb[9].mxu1 }
 0x438   :  { %v1731_v55 = vadd.f32 %v1730_v54, %v1729_v53  ;;  %v1732_v57 = vpop.f32.mrb[10].mxu1 }
 0x439   :  { %v1733_v58 = vpop.f32.mrb[11].mxu1 }
 0x43a   :  { %v1422_v59 = vpack.c.bf16 %v1731_v55, %v1731_v55 }
 0x43c   :  { %v1430_v60 = vadd.bf16 %v1429_v56, %v1422_v59 }
 0x43e   :  { %v1431_v61 = vmax.bf16 %v2150_v0, %v1430_v60 }
 0x440   :  { %1761 = vmatmul.mubr.bf16.vlgmr.msra.gmra.mrb[12].mxu1 %v1431_v61 }
 0x513   :  { %v1537_v63 = vpop.f32.mrb[12].mxu1 }
 0x514   :  { %v1538_v1 = vadd.f32 %v1704_v62, %v1537_v63  ;;  %v1762_v2 = vpop.f32.mrb[13].mxu1 }
 0x515   :  { %v1540_v3 = vpop.f32.mrb[14].mxu1 }
 0x516   :  { %1544 = vst.msk [vmem:[%s2367_s11] sm:$0xff] %vm1543_vm3, %v1538_v1  ;;  %v1763_v47 = vpop.f32.mrb[15].mxu1 }
 0x517   :  { %1549 = vsyncpa [#allocation3], 1 }
 0x518   :  { %1550 = vsyncpa [#allocation5], 1 }
 0x519   :  { %1551 = vsyncpa [#allocation8], 1 }
 0x51a   :  { %1552 = vsyncpa [#allocation11], 1 }

</bundles_post_ra>
